<compile_context>
chip_gen: v5e
topology: v5e:2x2
jax: 0.10.0
libtpu: 0.0.40
codegen_flags: <defaults>
</compile_context>

<pallas_src>
import numpy as np

import jax
import jax.numpy as jnp
from jax.experimental import pallas as pl
from jax.experimental.pallas import tpu as pltpu

_NORM_MEAN = 0.5
_NORM_STD = 0.25
_SCALE = 1.0 / (255.0 * _NORM_STD)   # (x/255 - mean)/std == x*_SCALE - _SHIFT
_SHIFT = _NORM_MEAN / _NORM_STD

# Layout / tiling parameters:
#   _LANES: lane-dense last dim (multiple of 128) => unmasked full-width stores.
#   _MAX_TILE_ROWS: 2048 x 512 tile = 1 MiB u8 in + 4 MiB f32 out per buffer;
#     double-buffered ~10 MiB -> fits every generation's scoped VMEM budget.
#   _SUBLANE_PACK: uint8 packs (32, 128) per vreg -> tiled blocks keep rows % 32.
_LANES = 512
_MAX_TILE_ROWS = 2048
_SUBLANE_PACK = 32
_MIN_PALLAS_PIXELS = 1 << 20   # below this, plain jnp is cheaper than a dispatch


def _round_up(x, m):
    return ((x + m - 1) // m) * m


def _bucket_rows(rows):
    """Round padded row counts to a bounded set of buckets (<=12.5% overhead)."""
    rows = max(rows, _SUBLANE_PACK)
    if rows <= 8 * _SUBLANE_PACK:
        return _round_up(rows, _SUBLANE_PACK)
    gran = max(_SUBLANE_PACK, 1 << (rows.bit_length() - 4))
    return _round_up(rows, gran)


def _plan_layout(total, same_shape):
    """Pick (lanes, rows, pad) for the flat uint8 pixel stream."""
    if same_shape:
        # Zero-pad fast path: pick the widest lane count that divides the total
        # so the kernel output reshapes to (B, N, C, H, W) with no trim copy.
        for lanes in (512, 256, 128):
            if total % lanes == 0:
                rows = total // lanes
                if rows <= _MAX_TILE_ROWS or rows % _SUBLANE_PACK == 0:
                    return lanes, rows, 0
    lanes = _LANES
    rows = _bucket_rows(pl.cdiv(total, lanes))
    return lanes, rows, rows * lanes - total


def _choose_tile_rows(rows):
    """Tile rows: full block for small/odd shapes, else aim for >=4 grid steps."""
    if rows % _SUBLANE_PACK != 0 or rows <= 4 * _SUBLANE_PACK:
        return rows                               # single full-array block (legal)
    t = _round_up(pl.cdiv(rows, 4), _SUBLANE_PACK)
    return min(_MAX_TILE_ROWS, t)


def _normalize_kernel(x_ref, o_ref):
    # Fused ToTensor + Normalize; uint8 -> f32 directly (no int32 hop).
    x = x_ref[...].astype(jnp.float32)
    o_ref[...] = x * jnp.float32(_SCALE) - jnp.float32(_SHIFT)


@jax.jit
def _normalize_2d(x2d):
    """(rows, lanes) uint8 -> (rows, lanes) float32, normalized."""
    rows, lanes = x2d.shape
    tile_rows = _choose_tile_rows(rows)
    grid = pl.cdiv(rows, tile_rows)
    return pl.pallas_call(
        _normalize_kernel,
        out_shape=jax.ShapeDtypeStruct((rows, lanes), jnp.float32),
        grid=(grid,),
        in_specs=[pl.BlockSpec((tile_rows, lanes), lambda i: (i, 0))],
        out_specs=pl.BlockSpec((tile_rows, lanes), lambda i: (i, 0)),
        compiler_params=pltpu.CompilerParams(
            # Row axis is embarrassingly parallel: v7x shards the grid across
            # both TensorCores; neutral on single-TC v5e/v6e.
            dimension_semantics=("parallel",),
            # Explicit, generation-portable VMEM budget (actual use ~10 MiB max).
            vmem_limit_bytes=32 << 20,
        ),
    )(x2d)


@jax.jit
def _normalize_small(x_u8):
    """Tiny-batch fallback: fused elementwise normalize, no Pallas dispatch."""
    return x_u8.astype(jnp.float32) * jnp.float32(_SCALE) - jnp.float32(_SHIFT)


def generic_collate(batch, *, min_pallas_pixels=_MIN_PALLAS_PIXELS):
    """Pallas/JAX equivalent of GenericCollate(training=False).forward(batch).

    batch: list of (images_uint8, label) with images_uint8 of shape (N, C, H, W).
    Returns (list of normalized float32 bags, int32 label vector).
    """
    if len(batch) == 0:
        return [], jnp.zeros((0,), jnp.int32)

    bags_np = [np.asarray(item[0], dtype=np.uint8) for item in batch]
    shapes = [b.shape for b in bags_np]
    sizes = [b.size for b in bags_np]
    total = sum(sizes)
    # TODO(synk): torch.LongTensor is int64; JAX x64 is off by default -> int32.
    labels = jnp.asarray([int(item[1]) for item in batch], dtype=jnp.int32)

    if total < max(min_pallas_pixels, 1):
        # Tiny batches: pallas_call fixed cost + padding is pure overhead.
        img_bags = [_normalize_small(jax.device_put(b)) for b in bags_np]
        return img_bags, labels

    same_shape = all(s == shapes[0] for s in shapes)
    lanes, rows, pad = _plan_layout(total, same_shape)

    # Host-side staging: ONE contiguous, pre-padded uint8 slab and a single
    # device_put -> the pallas_call is the only uint8 pass over device HBM.
    slab = np.empty((rows * lanes,), dtype=np.uint8)
    off = 0
    for b in bags_np:
        slab[off:off + b.size] = b.reshape(-1)
        off += b.size
    # Tail padding left uninitialized: normalized garbage rows are never read.
    x2d = jax.device_put(slab.reshape(rows, lanes))

    out2d = _normalize_2d(x2d)

    if same_shape and pad == 0:
        # Kernel output is exactly the batch: free contiguous reshape, no trim.
        out5d = out2d.reshape((len(batch),) + shapes[0])
        img_bags = [out5d[i] for i in range(len(batch))]
    else:
        # Ragged / padded: one slice per bag straight from the padded output
        # (no separate global [:n] trim pass).
        flat = out2d.reshape(-1)
        img_bags = []
        off = 0
        for shp, size in zip(shapes, sizes):
            img_bags.append(flat[off:off + size].reshape(shp))
            off += size

    return img_bags, labels


if __name__ == "__main__":
    key = jax.random.PRNGKey(0)

    def make_bag(k, n, c, h, w):
        imgs = jax.random.randint(k, (n, c, h, w), 0, 256, dtype=jnp.int32)
        return imgs.astype(jnp.uint8)

    def ref_bag(bag_u8):
        x = np.asarray(bag_u8).astype(np.float32)
        return (x / 255.0 - _NORM_MEAN) / _NORM_STD

    ok = True

    # Case 1: small same-shape batch -> zero-pad fast path, single-block grid.
    key, k0, k1 = jax.random.split(key, 3)
    batch1 = [(make_bag(k0, 8, 1, 16, 16), 0), (make_bag(k1, 8, 1, 16, 16), 1)]
    bags1, labels1 = generic_collate(batch1, min_pallas_pixels=0)
    for bag in bags1:
        jax.block_until_ready(bag)
    jax.block_until_ready(labels1)
    for (imgs, _), out in zip(batch1, bags1):
        ok &= out.shape == imgs.shape and out.dtype == jnp.float32
        ok &= bool(np.allclose(np.asarray(out), ref_bag(imgs), atol=1e-5))
    ok &= labels1.shape == (2,)
    ok &= bool(np.all(np.asarray(labels1) == np.array([0, 1], dtype=np.int32)))

    # Case 2: ragged bag shapes -> padded/bucketed path, per-bag slices.
    key, k0, k1 = jax.random.split(key, 3)
    batch2 = [(make_bag(k0, 3, 1, 16, 16), 1), (make_bag(k1, 5, 1, 24, 24), 0)]
    bags2, labels2 = generic_collate(batch2, min_pallas_pixels=0)
    for bag in bags2:
        jax.block_until_ready(bag)
    jax.block_until_ready(labels2)
    for (imgs, _), out in zip(batch2, bags2):
        ok &= out.shape == imgs.shape and out.dtype == jnp.float32
        ok &= bool(np.allclose(np.asarray(out), ref_bag(imgs), atol=1e-5))

    # Case 3: larger same-shape batch -> multi-step "parallel" grid (4 tiles).
    key, k0, k1 = jax.random.split(key, 3)
    batch3 = [(make_bag(k0, 16, 1, 64, 64), 1), (make_bag(k1, 16, 1, 64, 64), 0)]
    bags3, labels3 = generic_collate(batch3, min_pallas_pixels=0)
    for bag in bags3:
        jax.block_until_ready(bag)
    jax.block_until_ready(labels3)
    for (imgs, _), out in zip(batch3, bags3):
        ok &= bool(np.allclose(np.asarray(out), ref_bag(imgs), atol=1e-5))

    assert ok
    print("KERNEL_OK")
</pallas_src>

<mosaic_0001>
module attributes {stable_mosaic.version = 11 : i64} {
  func.func @_normalize_kernel(%arg0: i32, %arg1: memref<8x512xi8, #tpu.memory_space<vmem>>, %arg2: memref<8x512xf32, #tpu.memory_space<vmem>>) attributes {dimension_semantics = [#tpu.dimension_semantics<parallel>], iteration_bounds = array<i64: 1>, scalar_prefetch = 0 : i64, scratch_operands = 0 : i64, tpu.core_type = #tpu.core_type<tc>, window_params = [{transform_indices = @transform_0, window_bounds = array<i64: 8, 512>}, {transform_indices = @transform_1, window_bounds = array<i64: 8, 512>}]} {
    %c0 = arith.constant 0 : index
    %c0_0 = arith.constant 0 : index
    %0 = vector.load %arg1[%c0, %c0_0] : memref<8x512xi8, #tpu.memory_space<vmem>>, vector<8x512xi8>
    %1 = arith.uitofp %0 : vector<8x512xi8> to vector<8x512xf32>
    %cst = arith.constant 0.0156862754 : f32
    %2 = vector.broadcast %cst : f32 to vector<8x512xf32>
    %3 = arith.mulf %1, %2 : vector<8x512xf32>
    %cst_1 = arith.constant 2.000000e+00 : f32
    %4 = vector.broadcast %cst_1 : f32 to vector<8x512xf32>
    %5 = arith.subf %3, %4 : vector<8x512xf32>
    %c0_2 = arith.constant 0 : index
    %c0_3 = arith.constant 0 : index
    %6 = vector.load %arg2[%c0_2, %c0_3] : memref<8x512xf32, #tpu.memory_space<vmem>>, vector<8x512xf32>
    tpu.vector_store %arg2[%c0_2, %c0_3], %5 {strides = array<i32>} : memref<8x512xf32, #tpu.memory_space<vmem>>, vector<8x512xf32>,
    return
  }
  func.func @transform_0(%arg0: i32) -> (i32, i32) {
    %c0_i32 = arith.constant 0 : i32
    %c0_i32_0 = arith.constant 0 : i32
    return %arg0, %c0_i32 : i32, i32
  }
  func.func @transform_1(%arg0: i32) -> (i32, i32) {
    %c0_i32 = arith.constant 0 : i32
    %c0_i32_0 = arith.constant 0 : i32
    return %arg0, %c0_i32 : i32, i32
  }
}

</mosaic_0001>

<bundles_post_ra>
// kernel: _normalize_2d.1
= control target key start
LH: loop header
LB: loop body
LE: loop exit
PB: predicated region body
PF: predicated region fallthrough
CT: control target
= control target key end

     0   :  { %6 = vsyncpa [#allocation3], 0  ;;  %s141_s0 = inlined_call_operand.hbm [shape: u8[8,512], index: 0, kind: input, shape index: {}]   ;;  %s142_s1 = inlined_call_operand.hbm [shape: f32[8,512], index: 1, kind: output, shape index: {}]  }
   0x1   :  { %7 = vsyncpa [#allocation4], 0  ;;  %s13_s8 = sshll.u32 %s141_s0, 4  ;;  %s123_s9 = smov [#allocation2]   ;;  %s14_s8 = int_to_ptr.hbm [resolvable:$true] %s13_s8 }
   0x2   :  { %s15_s10 = sshll.u32 %s123_s9, 4  ;;  %s16_s10 = int_to_ptr.vmem [resolvable:$true] %s15_s10 }
   0x3   :  { %18 = dma.hbm_to_vmem [thread:$0]  %s14_s8, 128, %s16_s10, [#allocation3]  }
   0x4   :  { %119 = dma.done.wait [#allocation3], 128  }
   0x5   :  { %120 = vsyncadd [#allocation3], 4294967168  ;;  %v23_v0 = vld [vmem:[#allocation2] sm:$0xff]  ;;  %s124_s0 = smov [#allocation5]   ;;  %s55_s14 = sshll.u32 %s142_s1, 4  ;;  %s56_s14 = int_to_ptr.hbm [resolvable:$true] %s55_s14 }
   0x6   :  { %v24_v1 = vunpack.c.0.s8 %v23_v0  ;;  %v25_v2 = vunpack.c.1.s8 %v23_v0  ;;  %v26_v3 = vunpack.c.2.s8 %v23_v0  ;;  %v27_v4 = vunpack.c.3.s8 %v23_v0  ;;  %s53_s11 = sshll.u32 %s124_s0, 4  ;;  %s54_s11 = int_to_ptr.vmem [resolvable:$true] %s53_s11 }
   0x8   :  { %v28_v5 = vand.u32 255, %v24_v1  ;;  %v29_v6 = vand.u32 255, %v25_v2  ;;  %v30_v7 = vand.u32 255, %v26_v3  ;;  %v31_v8 = vand.u32 255, %v27_v4 }
   0xa   :  { %v32_v9 = vcvt.s32.f32 %v28_v5  ;;  %v33_v10 = vcvt.s32.f32 %v29_v6  ;;  %v34_v11 = vcvt.s32.f32 %v30_v7  ;;  %v35_v12 = vcvt.s32.f32 %v31_v8 }
   0xc   :  { %v36_v13 = vmul.f32 0.015686275, %v32_v9  ;;  %v37_v14 = vmul.f32 0.015686275, %v33_v10  ;;  %v38_v15 = vmul.f32 0.015686275, %v34_v11 }
   0xd   :  { %v39_v16 = vmul.f32 0.015686275, %v35_v12 }
   0xe   :  { %v65_v17 = vadd.f32 -2.0, %v36_v13  ;;  %v66_v18 = vadd.f32 -2.0, %v37_v14  ;;  %v67_v19 = vadd.f32 -2.0, %v38_v15 }
   0xf   :  { %v68_v20 = vadd.f32 -2.0, %v39_v16 }
  0x10   :  { %44 = vst [vmem:[#allocation5] sm:$0xff] %v65_v17 }
  0x11   :  { %45 = vst [vmem:[#allocation5 + $0x8] sm:$0xff] %v66_v18 }
  0x12   :  { %46 = vst [vmem:[#allocation5 + $0x10] sm:$0xff] %v67_v19 }
  0x13   :  { %47 = vst [vmem:[#allocation5 + $0x18] sm:$0xff] %v68_v20 }
  0x14   :  { %58 = dma.vmem_to_hbm [thread:$0]  %s54_s11, 512, %s56_s14, [#allocation4]  }
  0x15   :  { %121 = dma.done.wait [#allocation4], 512  }
  0x16   :  { %122 = vsyncadd [#allocation4], 4294966784 }
  0x17   :  { %63 = vsyncpa [#allocation3], 1 }
  0x18   :  { %64 = vsyncpa [#allocation4], 1 }

</bundles_post_ra>
